<compile_context>
chip_gen: v7x
topology: tpu7x:2x2x1
jax: 0.10.0
libtpu: 0.0.40
codegen_flags: <defaults>
</compile_context>

<pallas_src>
import jax
import jax.numpy as jnp
from jax.experimental import pallas as pl
from jax.experimental.pallas import tpu as pltpu

# ---- static configuration ----------------------------------------------------
B, CIN, H, W = 2, 1, 16, 16           # input (batch, channels, height, width)
COUT, K = 4, 3                         # conv out channels, kernel size (pad=0)
HO, WO = H - K + 1, W - K + 1          # 14 x 14
LSIZE = COUT * HO * WO                 # 784 (flattened conv features)
IN_FEAT = CIN * H * W                  # 256 (multiple of 128 -> lane-dense)
L1, L2 = 32, 8                         # linear layer widths
L1P, L2P = 128, 128                    # padded lane widths inside the kernel

HIGH = jax.lax.Precision.HIGHEST       # exact-f32 host-side reference math


# ---- single fused Pallas kernel -----------------------------------------------
def _fused_kernel(x_ref, w1_ref, b1_ref, w2_ref, b2_ref, o_ref):
    """x/mean(x) -> (conv folded into Linear1) -> Tanh -> Linear2 -> Tanh.

    x_ref : VMEM (B, 256)        flattened input image (lane-dense)
    w1_ref: VMEM (256, 128)      folded conv+Linear1 weight, cols >= 32 are zero
    b1_ref: VMEM (1, 128)        folded bias, cols >= 32 are zero
    w2_ref: VMEM (128, 128)      Linear2 weight, only [:32, :8] is non-zero
    b2_ref: VMEM (1, 128)        Linear2 bias, cols >= 8 are zero
    o_ref : VMEM (B, 8)
    """
    x = x_ref[...]
    # torch: output / torch.mean(output)  (mean over ALL elements of the batch)
    inv_mean = 1.0 / jnp.mean(x)               # one scalar reciprocal, then VPU mul
    xn = x * inv_mean
    h = jnp.tanh(
        jnp.dot(xn, w1_ref[...], preferred_element_type=jnp.float32) + b1_ref[...])
    y = jnp.tanh(
        jnp.dot(h, w2_ref[...], preferred_element_type=jnp.float32) + b2_ref[...])
    o_ref[...] = y[:, :L2]                     # drop the zero padding lanes


# ---- wrapper ------------------------------------------------------------------
@jax.jit
def net_forward(x, fused):
    # row-major flatten of (B, CIN, H, W) -> (B, 256): free bitcast; matches the
    # conv-input layout used when building the folded matrix below.
    x2 = x.reshape(B, IN_FEAT)
    out = pl.pallas_call(
        _fused_kernel,
        out_shape=jax.ShapeDtypeStruct((B, L2), jnp.float32),
        in_specs=[pl.BlockSpec(memory_space=pltpu.MemorySpace.VMEM)] * 5,
        out_specs=pl.BlockSpec(memory_space=pltpu.MemorySpace.VMEM),
    )(x2, fused["w1"], fused["b1"], fused["w2"], fused["b2"])
    # torch.unsqueeze(output, 1): Linear acts on the last dim, so the singleton
    # dim is pure shape glue -> add it back to give (B, 1, L2).
    return out[:, None, :]


# ---- deterministic parameter init (PyTorch-style uniform) ----------------------
def init_params(key):
    ks = jax.random.split(key, 6)

    def u(k, shape, fan_in):
        bound = 1.0 / jnp.sqrt(jnp.float32(fan_in))
        return jax.random.uniform(k, shape, jnp.float32, -bound, bound)

    return dict(
        cw=u(ks[0], (COUT, CIN, K, K), CIN * K * K),
        cb=u(ks[1], (COUT,), CIN * K * K),
        # Linear weights stored pre-transposed as (in, out) for y = x @ W + b,
        # with the `in` index in torch .view(B, -1) order (co, ho, wo).
        w1=u(ks[2], (LSIZE, L1), LSIZE),
        b1=u(ks[3], (1, L1), LSIZE),
        w2=u(ks[4], (L1, L2), L1),
        b2=u(ks[5], (1, L2), L1),
    )


# ---- init-time fold: conv + flatten + Linear1 -> one affine map ----------------
def fuse_params(params):
    """Fold the (linear, bias-only) conv into Linear1 and pad lanes to 128.

    Valid only because dropout=0 and there is no activation between the conv
    and the first Linear (resnet=False).  Runs once at init, not per forward.
    """
    cw, cb = params["cw"], params["cb"]
    w1, b1, w2, b2 = params["w1"], params["b1"], params["w2"], params["b2"]

    # Express the valid 3x3 conv as a dense (256, 784) matrix by convolving the
    # identity basis (one image per input pixel), flattened in torch .view order.
    basis = jnp.eye(IN_FEAT, dtype=jnp.float32).reshape(IN_FEAT, CIN, H, W)
    resp = jax.lax.conv_general_dilated(
        basis, cw, window_strides=(1, 1), padding="VALID",
        dimension_numbers=("NCHW", "OIHW", "NCHW"),
        precision=HIGH)                                       # (256, COUT, HO, WO)
    A = resp.reshape(IN_FEAT, LSIZE)                          # conv as a matrix

    w_eff = jnp.dot(A, w1, precision=HIGH)                    # (256, 32)
    b_eff = jnp.dot(jnp.repeat(cb, HO * WO), w1, precision=HIGH) + b1.reshape(-1)

    # Zero-pad lane dims to 128 so all in-kernel loads/matmuls are unmasked.
    w1p = jnp.zeros((IN_FEAT, L1P), jnp.float32).at[:, :L1].set(w_eff)
    b1p = jnp.zeros((1, L1P), jnp.float32).at[:, :L1].set(b_eff)
    w2p = jnp.zeros((L1P, L2P), jnp.float32).at[:L1, :L2].set(w2)
    b2p = jnp.zeros((1, L2P), jnp.float32).at[:, :L2].set(b2)
    return dict(w1=w1p, b1=b1p, w2=w2p, b2=b2p)


# ---- pure-JAX reference of the original (un-folded) forward --------------------
def reference_forward(x, params):
    xn = x / jnp.mean(x)
    conv = jax.lax.conv_general_dilated(
        xn, params["cw"], (1, 1), "VALID",
        dimension_numbers=("NCHW", "OIHW", "NCHW"), precision=HIGH)
    conv = conv + params["cb"][None, :, None, None]
    flat = conv.reshape(B, LSIZE)[:, None, :]                 # view + unsqueeze(1)
    h = jnp.tanh(jnp.matmul(flat, params["w1"], precision=HIGH) + params["b1"])
    return jnp.tanh(jnp.matmul(h, params["w2"], precision=HIGH) + params["b2"])


if __name__ == "__main__":
    key = jax.random.PRNGKey(0)
    pkey, xkey = jax.random.split(key)
    params = init_params(pkey)
    fused = fuse_params(params)
    # positive inputs so the global-mean normalization is well conditioned
    x = jax.random.uniform(xkey, (B, CIN, H, W), jnp.float32, 0.5, 1.5)

    y = net_forward(x, fused)
    jax.block_until_ready(y)
    assert y.shape == (B, 1, L2) and y.dtype == jnp.float32

    y_ref = reference_forward(x, params)
    assert jnp.allclose(y, y_ref, atol=1e-3, rtol=1e-3), (y, y_ref)
    print("KERNEL_OK")
</pallas_src>

<mosaic_0001>
module attributes {stable_mosaic.version = 11 : i64} {
  func.func @_fused_kernel(%arg0: memref<2x256xf32, #tpu.memory_space<vmem>>, %arg1: memref<256x128xf32, #tpu.memory_space<vmem>>, %arg2: memref<1x128xf32, #tpu.memory_space<vmem>>, %arg3: memref<128x128xf32, #tpu.memory_space<vmem>>, %arg4: memref<1x128xf32, #tpu.memory_space<vmem>>, %arg5: memref<2x8xf32, #tpu.memory_space<vmem>>) attributes {dimension_semantics = [], scalar_prefetch = 0 : i64, scratch_operands = 0 : i64, tpu.core_type = #tpu.core_type<tc>} {
    %c0 = arith.constant 0 : index
    %c0_0 = arith.constant 0 : index
    %0 = vector.load %arg0[%c0, %c0_0] : memref<2x256xf32, #tpu.memory_space<vmem>>, vector<2x256xf32>
    %1 = vector.shape_cast %0 : vector<2x256xf32> to vector<1x2x256xf32>
    %cst = arith.constant dense<0.000000e+00> : vector<1xf32>
    %2 = vector.multi_reduction <add>, %1, %cst [1, 2] : vector<1x2x256xf32> to vector<1xf32>
    %3 = vector.shape_cast %2 : vector<1xf32> to vector<1x1x1xf32>
    %4 = vector.extract %3[0, 0, 0] : f32 from vector<1x1x1xf32>
    %cst_1 = arith.constant 5.120000e+02 : f32
    %5 = arith.divf %4, %cst_1 : f32
    %cst_2 = arith.constant 1.000000e+00 : f32
    %6 = arith.divf %cst_2, %5 : f32
    %7 = vector.broadcast %6 : f32 to vector<2x256xf32>
    %8 = arith.mulf %0, %7 : vector<2x256xf32>
    %c0_3 = arith.constant 0 : index
    %c0_4 = arith.constant 0 : index
    %9 = vector.load %arg1[%c0_3, %c0_4] : memref<256x128xf32, #tpu.memory_space<vmem>>, vector<256x128xf32>
    %cst_5 = arith.constant dense<0.000000e+00> : vector<2x128xf32>
    %10 = tpu.matmul %8, %9, %cst_5 {dimension_numbers = #tpu.dot_dimension_numbers<[1], [0], [0], [1], [0, 0, 1, 1], [], []>} : vector<2x256xf32>, vector<256x128xf32>, vector<2x128xf32> -> vector<2x128xf32>
    %c0_6 = arith.constant 0 : index
    %c0_7 = arith.constant 0 : index
    %11 = vector.load %arg2[%c0_6, %c0_7] : memref<1x128xf32, #tpu.memory_space<vmem>>, vector<1x128xf32>
    %12 = vector.broadcast %11 : vector<1x128xf32> to vector<2x128xf32>
    %13 = arith.addf %10, %12 : vector<2x128xf32>
    %14 = math.tanh %13 : vector<2x128xf32>
    %c0_8 = arith.constant 0 : index
    %c0_9 = arith.constant 0 : index
    %15 = vector.load %arg3[%c0_8, %c0_9] : memref<128x128xf32, #tpu.memory_space<vmem>>, vector<128x128xf32>
    %cst_10 = arith.constant dense<0.000000e+00> : vector<2x128xf32>
    %16 = tpu.matmul %14, %15, %cst_10 {dimension_numbers = #tpu.dot_dimension_numbers<[1], [0], [0], [1], [0, 0, 1, 1], [], []>} : vector<2x128xf32>, vector<128x128xf32>, vector<2x128xf32> -> vector<2x128xf32>
    %c0_11 = arith.constant 0 : index
    %c0_12 = arith.constant 0 : index
    %17 = vector.load %arg4[%c0_11, %c0_12] : memref<1x128xf32, #tpu.memory_space<vmem>>, vector<1x128xf32>
    %18 = vector.broadcast %17 : vector<1x128xf32> to vector<2x128xf32>
    %19 = arith.addf %16, %18 : vector<2x128xf32>
    %20 = math.tanh %19 : vector<2x128xf32>
    %21 = vector.extract_strided_slice %20 {offsets = [0, 0], sizes = [2, 8], strides = [1, 1]} : vector<2x128xf32> to vector<2x8xf32>
    %c0_13 = arith.constant 0 : index
    %c0_14 = arith.constant 0 : index
    %22 = vector.load %arg5[%c0_13, %c0_14] : memref<2x8xf32, #tpu.memory_space<vmem>>, vector<2x8xf32>
    tpu.vector_store %arg5[%c0_13, %c0_14], %21 {strides = array<i32>} : memref<2x8xf32, #tpu.memory_space<vmem>>, vector<2x8xf32>,
    return
  }
}

</mosaic_0001>

<bundles_post_ra>
// kernel: net_forward.1
= control target key start
LH: loop header
LB: loop body
LE: loop exit
PB: predicated region body
PF: predicated region fallthrough
CT: control target
= control target key end

     0   :  { %10 = vsyncpa [#allocation3], 0  ;;  %s643_s0 = inlined_call_operand.vmem [shape: f32[2,256], index: 0, kind: input, shape index: {}]   ;;  %s644_s1 = inlined_call_operand.hbm [shape: f32[256,128], index: 1, kind: input, shape index: {}]   ;;  %s645_s2 = inlined_call_operand.vmem [shape: f32[1,128], index: 2, kind: input, shape index: {}]   ;;  %s646_s3 = inlined_call_operand.hbm [shape: f32[128,128], index: 3, kind: input, shape index: {}]   ;;  %s647_s4 = inlined_call_operand.vmem [shape: f32[1,128], index: 4, kind: input, shape index: {}]   ;;  %s648_s5 = inlined_call_operand.hbm [shape: f32[2,8], index: 5, kind: output, shape index: {}]  }
   0x1   :  { %11 = vsyncpa [#allocation6], 0 }
   0x2   :  { %12 = vsyncpa [#allocation4], 0  ;;  %s551_s18 = smov [#allocation2]   ;;  %s479_s22 = scalar_lea.hbm %s644_s1, 4096 }
   0x3   :  { %s20_s19 = sshll.u32 %s551_s18, 4  ;;  %p480_p0 = scmp.ne.s32.totalorder %s644_s1, %s479_s22  ;;  %s21_s19 = int_to_ptr.vmem [resolvable:$true] %s20_s19 }
   0x4   :  { %p483_p1 = scmp.lt.u32.totalorder %s479_s22, %s644_s1 }
   0x6   :  { %p485_p2 = pnand %p483_p1, %p480_p0 }
   0x8   :  { %488 = shalt.err (!%p485_p2)
}
   0x9   :  { %s489_s27 = scalar_lea.vmem %s21_s19, 4096  ;;  %p494_p4 = scmp.lt.s32.totalorder %s21_s19, %s21_s19 }
   0xa   :  { %p490_p3 = scmp.ne.s32.totalorder %s21_s19, %s489_s27  ;;  %p495_p5 = scmp.lt.s32.totalorder %s489_s27, %s489_s27 }
   0xc   :  { %p496_p6 = por %p495_p5, %p494_p4 }
   0xe   :  { %p497_p7 = pnand %p496_p6, %p490_p3 }
  0x10   :  { %500 = shalt.err (!%p497_p7)
}
  0x11   :  { %s552_s28 = smov 128   ;;  %s553_s29 = smov 8  }
  0x12   :  { %26 = dma.hbm_to_vmem [thread:$0]  %s644_s1, 4096, %s21_s19, [#allocation3], %s552_s28, %s552_s28, %s553_s29  }
  0x13   :  { %s554_s7 = smov [#allocation5]   ;;  %s501_s11 = scalar_lea.hbm %s646_s3, 2048 }
  0x14   :  { %s34_s8 = sshll.u32 %s554_s7, 4  ;;  %p502_p8 = scmp.ne.s32.totalorder %s646_s3, %s501_s11  ;;  %s35_s8 = int_to_ptr.vmem [resolvable:$true] %s34_s8 }
  0x15   :  { %p505_p9 = scmp.lt.u32.totalorder %s501_s11, %s646_s3 }
  0x17   :  { %p507_p10 = pnand %p505_p9, %p502_p8 }
  0x19   :  { %510 = shalt.err (!%p507_p10)
}
  0x1a   :  { %s511_s16 = scalar_lea.vmem %s35_s8, 2048  ;;  %p516_p12 = scmp.lt.s32.totalorder %s35_s8, %s35_s8 }
  0x1b   :  { %p512_p11 = scmp.ne.s32.totalorder %s35_s8, %s511_s16  ;;  %p517_p13 = scmp.lt.s32.totalorder %s511_s16, %s511_s16 }
  0x1d   :  { %p518_p0 = por %p517_p13, %p516_p12 }
  0x1f   :  { %p519_p1 = pnand %p518_p0, %p512_p11 }
  0x21   :  { %522 = shalt.err (!%p519_p1)
}
  0x22   :  { %40 = dma.hbm_to_vmem [thread:$0]  %s646_s3, 2048, %s35_s8, [#allocation6], %s552_s28, %s552_s28, %s553_s29  }
  0x23   :  { %545 = dma.done.wait [#allocation3], 4096  }
  0x24   :  { %546 = vsyncadd [#allocation3], 4294963200 }
  0x25   :  { %547 = dma.done.wait [#allocation6], 2048  }
  0x26   :  { %548 = vsyncadd [#allocation6], 4294965248  ;;  %v54_v0 = vlaneseq  ;;  %v555_v1 = vmov 1983009808   ;;  %v619_v6 = vld [vmem:[%s643_s0] sm:$0xf] }
  0x27   :  { %v52_v2 = vunpack.c.l.s4 %v555_v1  ;;  %vm61_vm0 = vcmask 1041408   ;;  %v98_v12 = vld [vmem:[#allocation2 + $0x80] sm:$0xff]  ;;  %v99_v13 = vld [vmem:[#allocation2 + $0x88] sm:$0xff]  ;;  %v100_v17 = vld [vmem:[#allocation2 + $0x90] sm:$0xff]  ;;  %vm557_vm1 = vmmov 0   ;;  %s559_s25 = smov [#allocation7]  }
  0x28   :  { %v55_v3 = vshrl.u32 %v54_v0, 7  ;;  %v82_v14 = vld [vmem:[#allocation2] sm:$0xff]  ;;  %v404_v15 = vpack.c.bf16 %v99_v13, %v98_v12  ;;  %v83_v16 = vld [vmem:[#allocation2 + $0x8] sm:$0xff]  ;;  %v101_v18 = vld [vmem:[#allocation2 + $0x98] sm:$0xff]  ;;  %s305_s26 = sshll.u32 %s559_s25, 4  ;;  %vm297_vm2 = vcmask 58368   ;;  %s306_s26 = int_to_ptr.vmem [resolvable:$true] %s305_s26 }
  0x29   :  { %v53_v4 = vunpack.c.0.s8 %v52_v2  ;;  %v406_v19 = vpack.c.bf16 %v83_v16, %v82_v14  ;;  %v408_v20 = vpack.c.bf16 %v101_v18, %v100_v17  ;;  %v84_v21 = vld [vmem:[#allocation2 + $0x10] sm:$0xff]  ;;  %v85_v22 = vld [vmem:[#allocation2 + $0x18] sm:$0xff]  ;;  %v102_v23 = vld [vmem:[#allocation2 + $0xa0] sm:$0xff]  ;;  %p528_p3 = scmp.lt.s32.totalorder %s306_s26, %s306_s26 }
  0x2a   :  { %405 = vmatprep.subr.bf16.mxu0 %v404_v15  ;;  %v103_v24 = vld [vmem:[#allocation2 + $0xa8] sm:$0xff]  ;;  %v410_v25 = vpack.c.bf16 %v85_v22, %v84_v21  ;;  %v86_v27 = vld [vmem:[#allocation2 + $0x20] sm:$0xff]  ;;  %v104_v29 = vld [vmem:[#allocation2 + $0xb0] sm:$0xff] }
  0x2b   :  { %v614_v5 = vsub.s32 %v53_v4, %v55_v3  ;;  %407 = vmatpush3.bf16.msra.mxu0 %v406_v19  ;;  %v412_v26 = vpack.c.bf16 %v103_v24, %v102_v23  ;;  %v87_v28 = vld [vmem:[#allocation2 + $0x28] sm:$0xff]  ;;  %v105_v30 = vld [vmem:[#allocation2 + $0xb8] sm:$0xff]  ;;  %v88_v33 = vld [vmem:[#allocation2 + $0x30] sm:$0xff]  ;;  %v556_v4 = vmov 0.0|0.0  }
  0x2c   :  { %409 = vmatprep.subr.bf16.mxu0 %v408_v20  ;;  %v414_v31 = vpack.c.bf16 %v87_v28, %v86_v27  ;;  %v416_v32 = vpack.c.bf16 %v105_v30, %v104_v29  ;;  %v89_v34 = vld [vmem:[#allocation2 + $0x38] sm:$0xff]  ;;  %v106_v35 = vld [vmem:[#allocation2 + $0xc0] sm:$0xff]  ;;  %v107_v36 = vld [vmem:[#allocation2 + $0xc8] sm:$0xff]  ;;  %436 = vmatprep.subr.bf16.mxu1 %v556_v4 }
  0x2d   :  { %v57_v7 = vrot.slane %v619_v6, %v614_v5  ;;  %v418_v37 = vpack.c.bf16 %v89_v34, %v88_v33  ;;  %v420_v38 = vpack.c.bf16 %v107_v36, %v106_v35  ;;  %v90_v39 = vld [vmem:[#allocation2 + $0x40] sm:$0xff]  ;;  %v91_v40 = vld [vmem:[#allocation2 + $0x48] sm:$0xff]  ;;  %v108_v41 = vld [vmem:[#allocation2 + $0xd0] sm:$0xff] }
  0x2e   :  { %v109_v42 = vld [vmem:[#allocation2 + $0xd8] sm:$0xff]  ;;  %v422_v43 = vpack.c.bf16 %v91_v40, %v90_v39  ;;  %v92_v45 = vld [vmem:[#allocation2 + $0x50] sm:$0xff]  ;;  %v110_v48 = vld [vmem:[#allocation2 + $0xe0] sm:$0xff] }
  0x2f   :  { %v58_v8 = vcombine.high %v57_v7, %v57_v7  ;;  %v62_v9 = vsel %vm61_vm0, %v57_v7, 0.0  ;;  %411 = vmatpush3.bf16.msra.mxu0 %v410_v25  ;;  %v424_v44 = vpack.c.bf16 %v109_v42, %v108_v41  ;;  %v93_v46 = vld [vmem:[#allocation2 + $0x58] sm:$0xff]  ;;  %v111_v49 = vld [vmem:[#allocation2 + $0xe8] sm:$0xff]  ;;  %v94_v51 = vld [vmem:[#allocation2 + $0x60] sm:$0xff] }
  0x30   :  { %413 = vmatprep.subr.bf16.mxu0 %v412_v26  ;;  %v426_v47 = vpack.c.bf16 %v93_v46, %v92_v45  ;;  %v428_v50 = vpack.c.bf16 %v111_v49, %v110_v48  ;;  %v95_v52 = vld [vmem:[#allocation2 + $0x68] sm:$0xff]  ;;  %v112_v55 = vld [vmem:[#allocation2 + $0xf0] sm:$0xff]  ;;  %v113_v56 = vld [vmem:[#allocation2 + $0xf8] sm:$0xff] }
  0x31   :  { %v63_v10 = vsel %vm61_vm0, %v58_v8, 0.0  ;;  %v430_v53 = vpack.c.bf16 %v95_v52, %v94_v51  ;;  %v96_v57 = vld [vmem:[#allocation2 + $0x70] sm:$0xff]  ;;  %v432_v59 = vpack.c.bf16 %v113_v56, %v112_v55  ;;  %v97_v60 = vld [vmem:[#allocation2 + $0x78] sm:$0xff]  ;;  %v203_v1 = vld [vmem:[#allocation5] sm:$0xff] }
  0x32   :  { %v64_v11 = vadd.f32 %v63_v10, %v62_v9  ;;  %v434_v61 = vpack.c.bf16 %v97_v60, %v96_v57  ;;  %v204_v2 = vld [vmem:[#allocation5 + $0x8] sm:$0xff]  ;;  %v205_v3 = vld [vmem:[#allocation5 + $0x10] sm:$0xff]  ;;  %v206_v8 = vld [vmem:[#allocation5 + $0x18] sm:$0xff] }
  0x33   :  { %415 = vmatpush3.bf16.msra.mxu0 %v414_v31  ;;  %v437_v7 = vpack.c.bf16 %v204_v2, %v203_v1  ;;  %v440_v10 = vpack.c.bf16 %v206_v8, %v205_v3  ;;  %v207_v12 = vld [vmem:[#allocation5 + $0x20] sm:$0xff]  ;;  %v208_v13 = vld [vmem:[#allocation5 + $0x28] sm:$0xff]  ;;  %v209_v15 = vld [vmem:[#allocation5 + $0x30] sm:$0xff] }
  0x34   :  { %65 = vadd.xlane.f32.xlu0 %v64_v11  ;;  %417 = vmatprep.subr.bf16.mxu0 %v416_v32  ;;  %v443_v14 = vpack.c.bf16 %v208_v13, %v207_v12  ;;  %v210_v16 = vld [vmem:[#allocation5 + $0x38] sm:$0xff]  ;;  %v211_v24 = vld [vmem:[#allocation5 + $0x40] sm:$0xff]  ;;  %v212_v25 = vld [vmem:[#allocation5 + $0x48] sm:$0xff] }
  0x35   :  { %438 = vmatpush3.bf16.msra.mxu1 %v437_v7  ;;  %v446_v17 = vpack.c.bf16 %v210_v16, %v209_v15  ;;  %v449_v26 = vpack.c.bf16 %v212_v25, %v211_v24  ;;  %v213_v27 = vld [vmem:[#allocation5 + $0x50] sm:$0xff]  ;;  %v214_v28 = vld [vmem:[#allocation5 + $0x58] sm:$0xff]  ;;  %v215_v30 = vld [vmem:[#allocation5 + $0x60] sm:$0xff] }
  0x36   :  { %439 = vmatprep.subr.bf16.mxu1 %v556_v4  ;;  %v452_v29 = vpack.c.bf16 %v214_v28, %v213_v27  ;;  %v216_v31 = vld [vmem:[#allocation5 + $0x68] sm:$0xff]  ;;  %v217_v33 = vld [vmem:[#allocation5 + $0x70] sm:$0xff]  ;;  %v315_v36 = vld [vmem:[%s645_s2] ss:$0 sm:$0xff]  ;;  %s523_s2 = scalar_lea.vmem %s306_s26, 32 }
  0x37   :  { %419 = vmatpush3.bf16.msra.mxu0 %v418_v37  ;;  %v455_v32 = vpack.c.bf16 %v216_v31, %v215_v30  ;;  %v316_v41 = vld [vmem:[%s647_s4] ss:$0 sm:$0xff]  ;;  %p524_p2 = scmp.ne.s32.totalorder %s306_s26, %s523_s2  ;;  %p529_p4 = scmp.lt.s32.totalorder %s523_s2, %s523_s2 }
  0x38   :  { %421 = vmatprep.subr.bf16.mxu0 %v420_v38 }
  0x39   :  { %441 = vmatpush3.bf16.msra.mxu1 %v440_v10  ;;  %p530_p5 = por %p529_p4, %p528_p3 }
  0x3a   :  { %442 = vmatprep.subr.bf16.mxu1 %v556_v4 }
  0x3b   :  { %423 = vmatpush3.bf16.msra.mxu0 %v422_v43  ;;  %p531_p6 = pnand %p530_p5, %p524_p2 }
  0x3c   :  { %425 = vmatprep.subr.bf16.mxu0 %v424_v44 }
  0x3d   :  { %444 = vmatpush3.bf16.msra.mxu1 %v443_v14 }
  0x3e   :  { %445 = vmatprep.subr.bf16.mxu1 %v556_v4 }
  0x3f   :  { %427 = vmatpush3.bf16.msra.mxu0 %v426_v47 }
  0x40   :  { %429 = vmatprep.subr.bf16.mxu0 %v428_v50 }
  0x41   :  { %447 = vmatpush3.bf16.msra.mxu1 %v446_v17 }
  0x42   :  { %448 = vmatprep.subr.bf16.mxu1 %v556_v4 }
  0x43   :  { %431 = vmatpush3.bf16.msra.mxu0 %v430_v53 }
  0x44   :  { %433 = vmatprep.subr.bf16.mxu0 %v432_v59 }
  0x45   :  { %450 = vmatpush3.bf16.msra.mxu1 %v449_v26 }
  0x46   :  { %451 = vmatprep.subr.bf16.mxu1 %v556_v4 }
  0x47   :  { %435 = vmatpush3.bf16.msra.mxu0 %v434_v61 }
  0x49   :  { %453 = vmatpush3.bf16.msra.mxu1 %v452_v29 }
  0x4a   :  { %454 = vmatprep.subr.bf16.mxu1 %v556_v4 }
  0x4d   :  { %456 = vmatpush3.bf16.msra.mxu1 %v455_v32 }
  0x4e   :  { %457 = vmatprep.subr.bf16.mxu1 %v556_v4 }
  0xc1   :  { %v66_v54 = vpop.xlane.xlu0 %65 }
  0xc2   :  { %v67_v58 = vrot.slane %v66_v54, 4 }
  0xc4   :  { %v68_v62 = vadd.f32 %v67_v58, %v66_v54 }
  0xc6   :  { %v69_v63 = vrot.slane %v68_v62, 2 }
  0xc8   :  { %v70_v0 = vadd.f32 %v69_v63, %v68_v62 }
  0xca   :  { %v71_v9 = vrot.slane %v70_v0, 1 }
  0xcc   :  { %v72_v11 = vadd.f32 %v71_v9, %v70_v0 }
  0xce   :  { %460 = vpush %v72_v11 }
  0xff   :  { %s461_s0 = spop %460 }
 0x100   :  { %s76_s3 = smul.f32 0.001953125, %s461_s0 }
 0x102   :  { %v77_v18 = vstv %s76_s3 }
 0x103   :  { %473 = vrcp.f32 %v77_v18 }
 0x10d   :  { %v474_v19 = vpop.eup %473 }
 0x10e   :  { %462 = vpush %v474_v19 }
 0x13f   :  { %s463_s20 = spop %462 }
 0x140   :  { %v80_v20 = vstv %s463_s20 }
 0x141   :  { %v81_v21 = vmul.f32 %v80_v20, %v619_v6  ;;  %v218_v6 = vld [vmem:[#allocation5 + $0x78] sm:$0xff] }
 0x142   :  { %v458_v34 = vpack.c.bf16 %v218_v6, %v217_v33 }
 0x143   :  { %v128_v22 = vrot.slane %v81_v21, %v614_v5  ;;  %v558_v5 = vmov 0.0  }
 0x144   :  { %401 = vmatprep.mubr.msk.f32.mxu1 %vm557_vm1, %v558_v5  ;;  %459 = vmatpush3.bf16.msra.mxu1 %v458_v34 }
 0x145   :  { %v129_v23 = vcombine.high %v128_v22, %v128_v22 }
 0x147   :  { %196 = vmatprep.mubr.f32.mxu0 %v129_v23 }
 0x148   :  { %197 = vmatmul.mubr.f32.vlgmr.msra.gmra.mrb[0].mxu0 %v128_v22 }
 0x21b   :  { %v349_v35 = vpop.f32.mrb[0].mxu0 }
 0x21c   :  { %v350_v37 = vpop.f32.mrb[1].mxu0 }
 0x21d   :  { %v351_v38 = vadd.f32 %v350_v37, %v349_v35 }
 0x21f   :  { %v199_v39 = vadd.f32 %v351_v38, %v315_v36 }
 0x221   :  { %475 = vtanh.f32 %v199_v39 }
 0x22b   :  { %v476_v40 = vpop.eup %475 }
 0x22c   :  { %402 = vmatmul.mubr.f32.vlgmr.msra.gmra.mrb[0].mxu1 %v476_v40 }
 0x2ff   :  { %v292_v42 = vpop.f32.mrb[0].mxu1 }
 0x300   :  { %v293_v43 = vadd.f32 %v316_v41, %v292_v42  ;;  %v403_v44 = vpop.f32.mrb[1].mxu1 }
 0x302   :  { %477 = vtanh.f32 %v293_v43 }
 0x30c   :  { %v478_v45 = vpop.eup %477 }
 0x30d   :  { %298 = vst.msk [vmem:[#allocation7] sm:$0x3] %vm297_vm2, %v478_v45 }
 0x30e   :  { %534 = shalt.err (!%p531_p6)
}
 0x30f   :  { %s535_s4 = scalar_lea.hbm %s648_s5, 32 }
 0x310   :  { %p536_p7 = scmp.ne.s32.totalorder %s648_s5, %s535_s4  ;;  %p539_p8 = scmp.lt.u32.totalorder %s535_s4, %s648_s5 }
 0x312   :  { %p541_p9 = pnand %p539_p8, %p536_p7 }
 0x314   :  { %544 = shalt.err (!%p541_p9)
}
 0x315   :  { %308 = dma.vmem_to_hbm [thread:$0]  %s306_s26, 32, %s648_s5, [#allocation4]  }
 0x316   :  { %549 = dma.done.wait [#allocation4], 32  }
 0x317   :  { %550 = vsyncadd [#allocation4], 4294967264 }
 0x318   :  { %312 = vsyncpa [#allocation3], 1 }
 0x319   :  { %313 = vsyncpa [#allocation6], 1 }
 0x31a   :  { %314 = vsyncpa [#allocation4], 1 }

</bundles_post_ra>
